<compile_context>
chip_gen: v7x
topology: tpu7x:2x2x1
jax: 0.10.0
libtpu: 0.0.40
codegen_flags: <defaults>
</compile_context>

<pallas_src>
import functools

import jax
import jax.numpy as jnp
import numpy as np
from jax.experimental import pallas as pl
from jax.experimental.pallas import tpu as pltpu


def _dice_partials_kernel(x_ref, t_ref, int_ref, p2_ref, t2_ref,
                          *, normalization, hw, tile_hw, need_mask):
    """Grid = (N, num_hw_tiles).  Axis 0 ('parallel') walks the batch, axis 1
    ('arbitrary') streams the flattened spatial dim.  The three (1, C, 1)
    output blocks are resident across axis 1 and used as accumulators."""
    j = pl.program_id(1)

    @pl.when(j == 0)
    def _():
        int_ref[...] = jnp.zeros_like(int_ref)
        p2_ref[...] = jnp.zeros_like(p2_ref)
        t2_ref[...] = jnp.zeros_like(t2_ref)

    x = x_ref[0].astype(jnp.float32)          # (C, tile_hw)
    t = t_ref[0].astype(jnp.float32)          # (C, tile_hw)

    if normalization == 'sigmoid':
        p = jax.nn.sigmoid(x)
    elif normalization == 'softmax':
        # softmax over channels (dim=1 in NCHW == axis 0 of the (C, tile) block);
        # the whole channel axis lives in one block so this is exact per position.
        p = jax.nn.softmax(x, axis=0)
    else:  # 'none'
        p = x

    if need_mask:
        # Ragged last tile: zero out lanes past the true spatial extent so
        # garbage in the partially-OOB block contributes nothing.
        lane = jax.lax.broadcasted_iota(jnp.int32, p.shape, 1)
        valid = (j * tile_hw + lane) < hw
        p = jnp.where(valid, p, 0.0)
        t = jnp.where(valid, t, 0.0)

    int_ref[0] += jnp.sum(p * t, axis=-1, keepdims=True)   # (C, 1)
    p2_ref[0] += jnp.sum(p * p, axis=-1, keepdims=True)    # (C, 1)
    t2_ref[0] += jnp.sum(t * t, axis=-1, keepdims=True)    # (C, 1)


def _choose_tile_hw(hw, c, x_dtype, t_dtype,
                    budget_bytes=12 * 1024 * 1024, max_tile=8192):
    """Largest lane tile s.t. 2 inputs x 2 pipeline buffers stay within a
    conservative VMEM budget (fits the 16 MiB scoped default on v5e)."""
    bytes_per_col = c * (jnp.dtype(x_dtype).itemsize + jnp.dtype(t_dtype).itemsize)
    cap = max(budget_bytes // (2 * bytes_per_col), 128)    # 2 = double buffering
    if hw <= min(cap, max_tile):
        return hw                                           # single full-extent tile
    tile = min(cap, max_tile)
    return max((tile // 128) * 128, 128)                    # multiple of 128


def dice_loss(x, target, weight=None, normalization='sigmoid',
              *, tile_hw=None, eps=1e-6):
    """JAX/Pallas equivalent of _AbstractDiceLoss.forward with the standard
    per-channel Dice.  x, target: (N, C, H, W)."""
    assert normalization in ('sigmoid', 'softmax', 'none')
    N, C, H, W = x.shape
    assert target.shape == x.shape
    HW = H * W

    # Free, contiguous reshape — no HBM copy, unlike an NCHW->(C,L) transpose.
    x3 = x.reshape(N, C, HW)
    t3 = target.reshape(N, C, HW)

    if tile_hw is None:
        tile_hw = _choose_tile_hw(HW, C, x.dtype, target.dtype)
    grid_j = pl.cdiv(HW, tile_hw)
    need_mask = (HW % tile_hw) != 0

    kernel = functools.partial(_dice_partials_kernel,
                               normalization=normalization,
                               hw=HW, tile_hw=tile_hw, need_mask=need_mask)

    out_shapes = tuple(jax.ShapeDtypeStruct((N, C, 1), jnp.float32)
                       for _ in range(3))
    out_spec = pl.BlockSpec((1, C, 1), lambda n, j: (n, 0, 0))
    in_spec = pl.BlockSpec((1, C, tile_hw), lambda n, j: (n, 0, j))

    inter_p, p2_p, t2_p = pl.pallas_call(
        kernel,
        out_shape=out_shapes,
        grid_spec=pltpu.PrefetchScalarGridSpec(
            num_scalar_prefetch=0,
            grid=(N, grid_j),
            in_specs=[in_spec, in_spec],
            out_specs=[out_spec, out_spec, out_spec],
        ),
        compiler_params=pltpu.CompilerParams(
            # batch axis shards across TensorCores (v7x); HW axis is the
            # streaming reduction with output-resident accumulators.
            dimension_semantics=("parallel", "arbitrary")),
    )(x3, t3)

    # Tiny finalize in the wrapper: combine per-batch partials, apply weight,
    # dice + mean.
    intersect = jnp.sum(inter_p, axis=(0, 2))                        # (C,)
    denom = jnp.sum(p2_p, axis=(0, 2)) + jnp.sum(t2_p, axis=(0, 2))  # (C,)
    if weight is not None:
        intersect = jnp.asarray(weight, jnp.float32).reshape(-1) * intersect
    per_channel_dice = 2.0 * intersect / jnp.maximum(denom, eps)
    return 1.0 - jnp.mean(per_channel_dice)


def _reference_dice_loss(x, target, weight=None, normalization='sigmoid',
                         eps=1e-6):
    """Pure-JAX reference mirroring the PyTorch semantics."""
    N, C, H, W = x.shape
    xf = x.astype(jnp.float32)
    if normalization == 'sigmoid':
        p = jax.nn.sigmoid(xf)
    elif normalization == 'softmax':
        p = jax.nn.softmax(xf, axis=1)
    else:
        p = xf
    t = target.astype(jnp.float32)
    pf = jnp.transpose(p, (1, 0, 2, 3)).reshape(C, -1)
    tf = jnp.transpose(t, (1, 0, 2, 3)).reshape(C, -1)
    intersect = jnp.sum(pf * tf, axis=-1)
    if weight is not None:
        intersect = jnp.asarray(weight, jnp.float32).reshape(-1) * intersect
    denom = jnp.sum(pf * pf, axis=-1) + jnp.sum(tf * tf, axis=-1)
    per_channel = 2.0 * intersect / jnp.maximum(denom, eps)
    return 1.0 - jnp.mean(per_channel)


if __name__ == "__main__":
    key = jax.random.PRNGKey(0)
    kx, kt, kw, kx2, kt2 = jax.random.split(key, 5)

    # Case 1: sigmoid normalization, per-channel (Cx1) weight buffer,
    # evenly-tiled HW.
    N, C, H, W = 2, 4, 16, 16
    x = jax.random.normal(kx, (N, C, H, W), dtype=jnp.float32)
    target = jax.random.bernoulli(kt, 0.5, (N, C, H, W)).astype(jnp.float32)
    weight = jax.random.uniform(kw, (C, 1), dtype=jnp.float32,
                                minval=0.5, maxval=1.5)

    loss = jax.block_until_ready(dice_loss(x, target, weight,
                                           normalization='sigmoid'))
    ref = _reference_dice_loss(x, target, weight, normalization='sigmoid')
    np.testing.assert_allclose(np.asarray(loss), np.asarray(ref),
                               rtol=1e-5, atol=1e-5)

    # Case 2: softmax normalization with a ragged tile (HW=100, tile=128)
    # to exercise the in-kernel lane mask.
    x2 = jax.random.normal(kx2, (1, 4, 10, 10), dtype=jnp.float32)
    t2 = jax.random.bernoulli(kt2, 0.5, (1, 4, 10, 10)).astype(jnp.float32)
    loss2 = jax.block_until_ready(dice_loss(x2, t2, None,
                                            normalization='softmax',
                                            tile_hw=128))
    ref2 = _reference_dice_loss(x2, t2, None, normalization='softmax')
    np.testing.assert_allclose(np.asarray(loss2), np.asarray(ref2),
                               rtol=1e-5, atol=1e-5)

    # Case 3: 'none' normalization (exact — masked, no pad trick).
    loss3 = jax.block_until_ready(dice_loss(x, target, None,
                                            normalization='none'))
    ref3 = _reference_dice_loss(x, target, None, normalization='none')
    np.testing.assert_allclose(np.asarray(loss3), np.asarray(ref3),
                               rtol=1e-5, atol=1e-5)

    print("KERNEL_OK")
</pallas_src>

<mosaic_0001>
module attributes {stable_mosaic.version = 11 : i64} {
  func.func @_dice_partials_kernel(%arg0: i32, %arg1: i32, %arg2: memref<1x4x256xf32, #tpu.memory_space<vmem>>, %arg3: memref<1x4x256xf32, #tpu.memory_space<vmem>>, %arg4: memref<1x4x1xf32, #tpu.memory_space<vmem>>, %arg5: memref<1x4x1xf32, #tpu.memory_space<vmem>>, %arg6: memref<1x4x1xf32, #tpu.memory_space<vmem>>) attributes {dimension_semantics = [#tpu.dimension_semantics<parallel>, #tpu.dimension_semantics<arbitrary>], iteration_bounds = array<i64: 2, 1>, scalar_prefetch = 0 : i64, scratch_operands = 0 : i64, tpu.core_type = #tpu.core_type<tc>, window_params = [{transform_indices = @transform_0, window_bounds = array<i64: 1, 4, 256>}, {transform_indices = @transform_1, window_bounds = array<i64: 1, 4, 256>}, {transform_indices = @transform_2, window_bounds = array<i64: 1, 4, 1>}, {transform_indices = @transform_3, window_bounds = array<i64: 1, 4, 1>}, {transform_indices = @transform_4, window_bounds = array<i64: 1, 4, 1>}]} {
    %c0_i32 = arith.constant 0 : i32
    %0 = arith.cmpi eq, %arg1, %c0_i32 : i32
    %1 = arith.extui %0 : i1 to i32
    %c0_i32_0 = arith.constant 0 : i32
    %2 = arith.cmpi ne, %1, %c0_i32_0 : i32
    scf.if %2 {
      %cst_27 = arith.constant 0.000000e+00 : f32
      %39 = vector.broadcast %cst_27 : f32 to vector<1x4x1xf32>
      %c0_28 = arith.constant 0 : index
      %c0_29 = arith.constant 0 : index
      %c0_30 = arith.constant 0 : index
      %40 = vector.load %arg4[%c0_28, %c0_29, %c0_30] : memref<1x4x1xf32, #tpu.memory_space<vmem>>, vector<1x4x1xf32>
      tpu.vector_store %arg4[%c0_28, %c0_29, %c0_30], %39 {strides = array<i32>} : memref<1x4x1xf32, #tpu.memory_space<vmem>>, vector<1x4x1xf32>,
      %cst_31 = arith.constant 0.000000e+00 : f32
      %41 = vector.broadcast %cst_31 : f32 to vector<1x4x1xf32>
      %c0_32 = arith.constant 0 : index
      %c0_33 = arith.constant 0 : index
      %c0_34 = arith.constant 0 : index
      %42 = vector.load %arg5[%c0_32, %c0_33, %c0_34] : memref<1x4x1xf32, #tpu.memory_space<vmem>>, vector<1x4x1xf32>
      tpu.vector_store %arg5[%c0_32, %c0_33, %c0_34], %41 {strides = array<i32>} : memref<1x4x1xf32, #tpu.memory_space<vmem>>, vector<1x4x1xf32>,
      %cst_35 = arith.constant 0.000000e+00 : f32
      %43 = vector.broadcast %cst_35 : f32 to vector<1x4x1xf32>
      %c0_36 = arith.constant 0 : index
      %c0_37 = arith.constant 0 : index
      %c0_38 = arith.constant 0 : index
      %44 = vector.load %arg6[%c0_36, %c0_37, %c0_38] : memref<1x4x1xf32, #tpu.memory_space<vmem>>, vector<1x4x1xf32>
      tpu.vector_store %arg6[%c0_36, %c0_37, %c0_38], %43 {strides = array<i32>} : memref<1x4x1xf32, #tpu.memory_space<vmem>>, vector<1x4x1xf32>,
    } else {
    }
    %c0 = arith.constant 0 : index
    %c0_1 = arith.constant 0 : index
    %c0_2 = arith.constant 0 : index
    %3 = vector.load %arg2[%c0, %c0_1, %c0_2] : memref<1x4x256xf32, #tpu.memory_space<vmem>>, vector<1x4x256xf32>
    %4 = vector.shape_cast %3 : vector<1x4x256xf32> to vector<4x256xf32>
    %c0_3 = arith.constant 0 : index
    %c0_4 = arith.constant 0 : index
    %c0_5 = arith.constant 0 : index
    %5 = vector.load %arg3[%c0_3, %c0_4, %c0_5] : memref<1x4x256xf32, #tpu.memory_space<vmem>>, vector<1x4x256xf32>
    %6 = vector.shape_cast %5 : vector<1x4x256xf32> to vector<4x256xf32>
    %7 = arith.negf %4 : vector<4x256xf32>
    %8 = math.exp %7 : vector<4x256xf32>
    %cst = arith.constant 1.000000e+00 : f32
    %9 = vector.broadcast %cst : f32 to vector<4x256xf32>
    %10 = arith.addf %9, %8 : vector<4x256xf32>
    %11 = arith.divf %9, %10 : vector<4x256xf32>
    %c0_6 = arith.constant 0 : index
    %c0_7 = arith.constant 0 : index
    %c0_8 = arith.constant 0 : index
    %12 = vector.load %arg4[%c0_6, %c0_7, %c0_8] : memref<1x4x1xf32, #tpu.memory_space<vmem>>, vector<1x4x1xf32>
    %13 = vector.shape_cast %12 : vector<1x4x1xf32> to vector<4x1xf32>
    %14 = arith.mulf %11, %6 : vector<4x256xf32>
    %cst_9 = arith.constant dense<0.000000e+00> : vector<4xf32>
    %15 = vector.multi_reduction <add>, %14, %cst_9 [1] : vector<4x256xf32> to vector<4xf32>
    %16 = vector.shape_cast %15 : vector<4xf32> to vector<4x1xf32>
    %17 = arith.addf %13, %16 : vector<4x1xf32>
    %c0_10 = arith.constant 0 : index
    %c0_11 = arith.constant 0 : index
    %c0_12 = arith.constant 0 : index
    %18 = vector.load %arg4[%c0_10, %c0_11, %c0_12] : memref<1x4x1xf32, #tpu.memory_space<vmem>>, vector<1x4x1xf32>
    %19 = vector.shape_cast %18 : vector<1x4x1xf32> to vector<4x1xf32>
    %20 = vector.shape_cast %17 : vector<4x1xf32> to vector<1x4x1xf32>
    tpu.vector_store %arg4[%c0_10, %c0_11, %c0_12], %20 {strides = array<i32>} : memref<1x4x1xf32, #tpu.memory_space<vmem>>, vector<1x4x1xf32>,
    %c0_13 = arith.constant 0 : index
    %c0_14 = arith.constant 0 : index
    %c0_15 = arith.constant 0 : index
    %21 = vector.load %arg5[%c0_13, %c0_14, %c0_15] : memref<1x4x1xf32, #tpu.memory_space<vmem>>, vector<1x4x1xf32>
    %22 = vector.shape_cast %21 : vector<1x4x1xf32> to vector<4x1xf32>
    %23 = arith.mulf %11, %11 : vector<4x256xf32>
    %cst_16 = arith.constant dense<0.000000e+00> : vector<4xf32>
    %24 = vector.multi_reduction <add>, %23, %cst_16 [1] : vector<4x256xf32> to vector<4xf32>
    %25 = vector.shape_cast %24 : vector<4xf32> to vector<4x1xf32>
    %26 = arith.addf %22, %25 : vector<4x1xf32>
    %c0_17 = arith.constant 0 : index
    %c0_18 = arith.constant 0 : index
    %c0_19 = arith.constant 0 : index
    %27 = vector.load %arg5[%c0_17, %c0_18, %c0_19] : memref<1x4x1xf32, #tpu.memory_space<vmem>>, vector<1x4x1xf32>
    %28 = vector.shape_cast %27 : vector<1x4x1xf32> to vector<4x1xf32>
    %29 = vector.shape_cast %26 : vector<4x1xf32> to vector<1x4x1xf32>
    tpu.vector_store %arg5[%c0_17, %c0_18, %c0_19], %29 {strides = array<i32>} : memref<1x4x1xf32, #tpu.memory_space<vmem>>, vector<1x4x1xf32>,
    %c0_20 = arith.constant 0 : index
    %c0_21 = arith.constant 0 : index
    %c0_22 = arith.constant 0 : index
    %30 = vector.load %arg6[%c0_20, %c0_21, %c0_22] : memref<1x4x1xf32, #tpu.memory_space<vmem>>, vector<1x4x1xf32>
    %31 = vector.shape_cast %30 : vector<1x4x1xf32> to vector<4x1xf32>
    %32 = arith.mulf %6, %6 : vector<4x256xf32>
    %cst_23 = arith.constant dense<0.000000e+00> : vector<4xf32>
    %33 = vector.multi_reduction <add>, %32, %cst_23 [1] : vector<4x256xf32> to vector<4xf32>
    %34 = vector.shape_cast %33 : vector<4xf32> to vector<4x1xf32>
    %35 = arith.addf %31, %34 : vector<4x1xf32>
    %c0_24 = arith.constant 0 : index
    %c0_25 = arith.constant 0 : index
    %c0_26 = arith.constant 0 : index
    %36 = vector.load %arg6[%c0_24, %c0_25, %c0_26] : memref<1x4x1xf32, #tpu.memory_space<vmem>>, vector<1x4x1xf32>
    %37 = vector.shape_cast %36 : vector<1x4x1xf32> to vector<4x1xf32>
    %38 = vector.shape_cast %35 : vector<4x1xf32> to vector<1x4x1xf32>
    tpu.vector_store %arg6[%c0_24, %c0_25, %c0_26], %38 {strides = array<i32>} : memref<1x4x1xf32, #tpu.memory_space<vmem>>, vector<1x4x1xf32>,
    return
  }
  func.func @transform_0(%arg0: i32, %arg1: i32) -> (i32, i32, i32) {
    %c0_i32 = arith.constant 0 : i32
    %c0_i32_0 = arith.constant 0 : i32
    return %arg0, %c0_i32, %arg1 : i32, i32, i32
  }
  func.func @transform_1(%arg0: i32, %arg1: i32) -> (i32, i32, i32) {
    %c0_i32 = arith.constant 0 : i32
    %c0_i32_0 = arith.constant 0 : i32
    return %arg0, %c0_i32, %arg1 : i32, i32, i32
  }
  func.func @transform_2(%arg0: i32, %arg1: i32) -> (i32, i32, i32) {
    %c0_i32 = arith.constant 0 : i32
    %c0_i32_0 = arith.constant 0 : i32
    %c0_i32_1 = arith.constant 0 : i32
    return %arg0, %c0_i32, %c0_i32_0 : i32, i32, i32
  }
  func.func @transform_3(%arg0: i32, %arg1: i32) -> (i32, i32, i32) {
    %c0_i32 = arith.constant 0 : i32
    %c0_i32_0 = arith.constant 0 : i32
    %c0_i32_1 = arith.constant 0 : i32
    return %arg0, %c0_i32, %c0_i32_0 : i32, i32, i32
  }
  func.func @transform_4(%arg0: i32, %arg1: i32) -> (i32, i32, i32) {
    %c0_i32 = arith.constant 0 : i32
    %c0_i32_0 = arith.constant 0 : i32
    %c0_i32_1 = arith.constant 0 : i32
    return %arg0, %c0_i32, %c0_i32_0 : i32, i32, i32
  }
}

</mosaic_0001>

<bundles_post_ra>
// kernel: tpu_custom_call.1
= control target key start
LH: loop header
LB: loop body
LE: loop exit
PB: predicated region body
PF: predicated region fallthrough
CT: control target
= control target key end

     0   :  { %10 = vsyncpa [#allocation3], 0  ;;  %s943_s0 = inlined_call_operand.hbm [shape: f32[2,4,256], index: 0, kind: input, shape index: {}]   ;;  %s944_s1 = inlined_call_operand.hbm [shape: f32[2,4,256], index: 1, kind: input, shape index: {}]   ;;  %s945_s2 = inlined_call_operand.vmem [shape: f32[2,4,1], index: 2, kind: output, shape index: {0}]   ;;  %s946_s3 = inlined_call_operand.vmem [shape: f32[2,4,1], index: 3, kind: output, shape index: {1}]   ;;  %s947_s4 = inlined_call_operand.vmem [shape: f32[2,4,1], index: 4, kind: output, shape index: {2}]  }
   0x1   :  { %12 = vsyncpa [#allocation3 + $0x1], 0 }
   0x2   :  { %13 = vsyncpa [#allocation5], 0 }
   0x3   :  { %15 = vsyncpa [#allocation5 + $0x1], 0  ;;  %s743_s15 = smov 0   ;;  %s745_s16 = smov 0  }
   0x4   :  { %s747_s17 = smov 0   ;;  %s749_s18 = smov 0  }
   0x5   :  { %s751_s19 = smov 0   ;;  %s753_s20 = smov 0  }
   0x6 LB: > { %s513_s21 = sadd.s32 4294967295, %s713_s20   ;;  %s33_s22 = sadd.s32 1, %s709_s19  ;;  %s713_s20 = sphi %s753_s20, %s21_s20   ;;  %s709_s19 = sphi %s751_s19, %s961_s19   ;;  %s705_s18 = sphi %s749_s18, %s960_s18   ;;  %s701_s17 = sphi %s747_s17, %s959_s17   ;;  %s697_s16 = sphi %s745_s16, %s958_s16   ;;  %s693_s15 = sphi %s743_s15, %s957_s15  }
   0x7   : > { %p35_p0 = scmp.ge.s32.totalorder %s33_s22, 2  ;;  %s42_s23 = sadd.s32 1, %s701_s17 }
   0x8   : > { %p49_p1 = scmp.ne.s32.totalorder %s701_s17, %s697_s16  ;;  %p50_p2 = scmp.eq.s32.totalorder %s713_s20, 0 }
   0x9   : > { %s963_s22 = smov (%p35_p0, %s33_s22), 0  ;;  %p55_p4 = scmp.ne.s32.totalorder %s697_s16, %s693_s15 }
   0xa   : > { %p779_p3 = por %p50_p2, %p49_p1  ;;  %s37_s25 = ssub.s32 %s709_s19, %s963_s22 }
   0xb   : > { %p56_p5 = scmp.eq.s32.totalorder %s513_s21, 0  ;;  %p40_p6 = scmp.eq.s32.totalorder %s37_s25, 0 }
   0xc   : > { %p545_p8 = scmp.lt.s32.totalorder %s713_s20, 2  ;;  %s795_s28 = sand.u32 1, %s701_s17  }
   0xd   : > { %p786_p7 = por %p56_p5, %p55_p4  ;;  %s532_s29 = sshll.u32 %s709_s19, 7 }
   0xe   : > { %s792_s27 = scalar_select %p40_p6, %s701_s17, %s42_s23  }
   0xf   : > { %s950_s26 = scalar_select %p786_p7, 1, 0 }
  0x10   : > { %s517_s30 = sshll.u32 %s795_s28, 3  ;;  %s804_s7 = scalar_lea.hbm %s943_s0, %s532_s29 }
  0x11   : > { %s189_s8 = scalar_lea.vmem [#allocation2], %s517_s30  ;;  %p810_p9 = pnand %p545_p8, %p779_p3 }
  0x12   : > { %s199_s9 = sshll.u32 %s189_s8, 4  ;;  %s186_s11 = scalar_lea.sflag [#allocation3], %s795_s28  ;;  %s814_s9 = int_to_ptr.vmem [resolvable:$true] %s199_s9 }
  0x13   : > { %s599_s12 = scalar_lea.hbm %s804_s7, 128  ;;  %p601_p13 = pneg %p810_p9 }
  0x14   : > { %p600_p12 = scmp.ne.s32.totalorder %s804_s7, %s599_s12  ;;  %s604_s15 = scalar_lea.hbm %s943_s0, 256 }
  0x15   : > { %p605_p2 = scmp.lt.u32.totalorder %s804_s7, %s943_s0  ;;  %p606_p3 = scmp.lt.u32.totalorder %s604_s15, %s599_s12 }
  0x16   : > { %p602_p0 = pnand %p601_p13, %p600_p12  ;;  %p608_p5 = scmp.lt.u32.totalorder %s599_s12, %s804_s7 }
  0x17   : > { %p607_p4 = por %p606_p3, %p605_p2 }
  0x18   : > { %p603_p1 = pneg %p602_p0 }
  0x19   : > { %p609_p6 = por %p608_p5, %p607_p4 }
  0x1b   : > { %p610_p8 = pnand %p609_p6, %p603_p1 }
  0x1d   : > { %613 = shalt.err (!%p610_p8)
}
  0x1e   : > { %s614_s24 = scalar_lea.vmem %s814_s9, 128  ;;  %s715_s25 = smov [#allocation2]  }
  0x1f   : > { %p615_p12 = scmp.ne.s32.totalorder %s814_s9, %s614_s24  ;;  %s619_s5 = sshll.u32 %s715_s25, 4  ;;  %s620_s5 = int_to_ptr.vmem [resolvable:$false] %s619_s5 }
  0x20   : > { %s621_s6 = scalar_lea.vmem %s620_s5, 256  ;;  %p622_p11 = scmp.lt.s32.totalorder %s814_s9, %s620_s5 }
  0x21   : > { %p617_p0 = pnand %p615_p12, %p601_p13  ;;  %p623_p2 = scmp.lt.s32.totalorder %s621_s6, %s614_s24 }
  0x23   : > { %p618_p10 = pneg %p617_p0  ;;  %p624_p3 = por %p623_p2, %p622_p11 }
  0x25   : > { %p625_p4 = pnand %p624_p3, %p618_p10 }
  0x27   : > { %628 = shalt.err (!%p625_p4)
}
  0x28   : > { %541 = dma.hbm_to_vmem [thread:$0]  (!%p810_p9), %s804_s7, 128, %s814_s9, %s186_s11  }
  0x29   : > { %p952_p1 = scmp.lt.s32.totalorder %s713_s20, 3  ;;  %p953_p5 = scmp.ge.s32.totalorder %s713_s20, 1 }
  0x2a   : > { %s857_s14 = scalar_lea.hbm %s944_s1, %s532_s29  ;;  %s210_s15 = scalar_lea.vmem [#allocation4], %s517_s30 }
  0x2b   : > { %p848_p6 = pnand %p953_p5, %p952_p1  ;;  %s220_s21 = sshll.u32 %s210_s15, 4  ;;  %s221_s21 = int_to_ptr.vmem [resolvable:$true] %s220_s21 }
  0x2c   : > { %s207_s7 = scalar_lea.sflag [#allocation5], %s795_s28  ;;  %s629_s9 = scalar_lea.hbm %s857_s14, 128 }
  0x2d   : > { %s954_s8 = scalar_select %p848_p6, 1, 0 }
  0x2e   : > { %p630_p10 = scmp.ne.s32.totalorder %s857_s14, %s629_s9  ;;  %s634_s29 = scalar_lea.hbm %s944_s1, 256 }
  0x2f   : > { %p635_p12 = scmp.lt.u32.totalorder %s857_s14, %s944_s1  ;;  %p636_p0 = scmp.lt.u32.totalorder %s634_s29, %s629_s9 }
  0x30   : > { %p632_p11 = pnand %p630_p10, %p601_p13  ;;  %p638_p3 = scmp.lt.u32.totalorder %s629_s9, %s857_s14 }
  0x31   : > { %p637_p2 = por %p636_p0, %p635_p12 }
  0x32   : > { %p633_p8 = pneg %p632_p11 }
  0x33   : > { %p639_p4 = por %p638_p3, %p637_p2 }
  0x35   : > { %p640_p1 = pnand %p639_p4, %p633_p8 }
  0x37   : > { %643 = shalt.err (!%p640_p1)
}
  0x38   : > { %s644_s28 = scalar_lea.vmem %s221_s21, 128  ;;  %s716_s30 = smov [#allocation4]  }
  0x39   : > { %p645_p5 = scmp.ne.s32.totalorder %s221_s21, %s644_s28  ;;  %s649_s5 = sshll.u32 %s716_s30, 4  ;;  %s650_s5 = int_to_ptr.vmem [resolvable:$false] %s649_s5 }
  0x3a   : > { %s651_s6 = scalar_lea.vmem %s650_s5, 256  ;;  %p652_p7 = scmp.lt.s32.totalorder %s221_s21, %s650_s5 }
  0x3b   : > { %p647_p10 = pnand %p645_p5, %p601_p13  ;;  %p653_p6 = scmp.lt.s32.totalorder %s651_s6, %s644_s28 }
  0x3d   : > { %p648_p11 = pneg %p647_p10  ;;  %p654_p0 = por %p653_p6, %p652_p7 }
  0x3f   : > { %p655_p12 = pnand %p654_p0, %p648_p11 }
  0x41   : > { %658 = shalt.err (!%p655_p12)
}
  0x42   : > { %544 = dma.hbm_to_vmem [thread:$0]  (!%p810_p9), %s857_s14, 128, %s221_s21, %s207_s7  }
  0x43   : > { %p955_p8 = scmp.ne.s32.totalorder %s954_s8, 0 }
  0x44   : > { %s231_s12 = sand.u32 (!%p955_p8), 1, %s697_s16   ;;  %p956_p13 = scmp.ne.s32.totalorder (!%p955_p8), %s950_s26, 0 }
  0x45   : > { %229 = sbr.rel (%p955_p8) target bundleno = 262 (0x106), region = 28  ;;  %s524_s13 = sshll.u32 (!%p955_p8), %s231_s12, 3 }
  0x46   : > { %s232_s15 = scalar_lea.sflag (!%p955_p8), [#allocation3], %s231_s12  ;;  %s235_s9 = scalar_lea.vmem (!%p955_p8), [#allocation2], %s524_s13 }
  0x4c   : > { %684 = dma.done.wait (%p956_p13), %s232_s15, 128  }
  0x4d   : > { %686 = vsyncadd (%p956_p13), %s232_s15, 4294967168  ;;  %s241_s11 = scalar_lea.sflag [#allocation5], %s231_s12  ;;  %s244_s23 = scalar_lea.vmem [#allocation4], %s524_s13 }
  0x4e   : > { %688 = dma.done.wait (%p956_p13), %s241_s11, 128  }
  0x4f   : > { %690 = vsyncadd (%p956_p13), %s241_s11, 4294967168  ;;  %p283_p7 = scmp.lt.s32.totalorder %s705_s18, 1  ;;  %vm299_vm0 = vcmask 3072   ;;  %v717_v0 = vmov 0.0   ;;  %v303_v1 = vld [vmem:[%s235_s9] sm:$0xff]  ;;  %v304_v2 = vld [vmem:[%s244_s23] sm:$0xff] }
  0x50   : > { %v529_v3 = vmul.f32 -1.442695, %v303_v1  ;;  %v338_v4 = vmul.f32 %v304_v2, %v304_v2  ;;  %vm316_vm1 = vcmask 1043456  }
  0x51   : > { %s965_s18 = smov (!%p283_p7, %s705_s18), 1 }
  0x52   : > { %s894_s10 = sshll.u32 %s965_s18, 2  ;;  %595 = vpow2.f32 %v529_v3  ;;  %v340_v5 = vcombine.high %v338_v4, %v338_v4  ;;  %v342_v6 = vsel %vm316_vm1, %v338_v4, 0.0 }
  0x53   : > { %s900_s21 = scalar_lea.vmem %s945_s2, %s894_s10  ;;  %s294_s7 = scalar_lea.vmem %s947_s4, %s894_s10 }
  0x54   : > { %300 = vst.msk [vmem:[%s900_s21] sm:$0xf] %vm299_vm0, %v717_v0  ;;  %v343_v7 = vsel %vm316_vm1, %v340_v5, 0.0  ;;  %s290_s25 = scalar_lea.vmem %s946_s3, %s894_s10  ;;  %302 = vst.msk [vmem:[%s294_s7] sm:$0xf] %vm299_vm0, %v717_v0 }
  0x55   : > { %v344_v8 = vadd.f32 %v343_v7, %v342_v6  ;;  %301 = vst.msk [vmem:[%s290_s25] sm:$0xf] %vm299_vm0, %v717_v0 }
  0x57   : > { %345 = vadd.xlane.f32.xlu1 %v344_v8 }
  0x5b   : > { %v337_v22 = vld [vmem:[%s294_s7] sm:$0xf] }
  0x5c   : > { %v596_v9 = vpop.eup %595  ;;  %v311_v25 = vld [vmem:[%s900_s21] sm:$0xf] }
  0x5d   : > { %v308_v10 = vadd.f32 1.0, %v596_v9  ;;  %v325_v28 = vld [vmem:[%s290_s25] sm:$0xf] }
  0x5f   : > { %597 = vrcp.f32 %v308_v10 }
  0x69   : > { %v598_v11 = vpop.eup %597 }
  0x6a   : > { %v312_v12 = vmul.f32 %v598_v11, %v304_v2  ;;  %v326_v13 = vmul.f32 %v598_v11, %v598_v11 }
  0x6c   : > { %v314_v14 = vcombine.high %v312_v12, %v312_v12  ;;  %v317_v15 = vsel %vm316_vm1, %v312_v12, 0.0  ;;  %v328_v16 = vcombine.high %v326_v13, %v326_v13  ;;  %v330_v18 = vsel %vm316_vm1, %v326_v13, 0.0 }
  0x6e   : > { %v318_v17 = vsel %vm316_vm1, %v314_v14, 0.0  ;;  %v331_v19 = vsel %vm316_vm1, %v328_v16, 0.0 }
  0x6f   : > { %v319_v20 = vadd.f32 %v318_v17, %v317_v15  ;;  %v332_v21 = vadd.f32 %v331_v19, %v330_v18 }
  0x71   : > { %320 = vadd.xlane.f32.xlu0 %v319_v20 }
  0x75   : > { %333 = vadd.xlane.f32.xlu0 %v332_v21 }
  0xe4   : > { %v346_v23 = vpop.xlane.xlu1 %345 }
  0xe5   : > { %v347_v24 = vadd.f32 %v346_v23, %v337_v22 }
  0xe7   : > { %348 = vst.msk [vmem:[%s294_s7] sm:$0xf] %vm299_vm0, %v347_v24 }
  0xfe   : > { %v321_v26 = vpop.xlane.xlu0 %320 }
  0xff   : > { %v322_v27 = vadd.f32 %v321_v26, %v311_v25 }
 0x101   : > { %324 = vst.msk [vmem:[%s900_s21] sm:$0xf] %vm299_vm0, %v322_v27 }
 0x102   : > { %v334_v29 = vpop.xlane.xlu0 %333 }
 0x103   : > { %v335_v30 = vadd.f32 %v334_v29, %v325_v28 }
 0x105   : > { %336 = vst.msk [vmem:[%s290_s25] sm:$0xf] %vm299_vm0, %v335_v30 }
 0x106 PF: > { %s21_s20 = sadd.s32 1, %s713_s20   ;;  %s957_s15 = smov %s697_s16 }
 0x107   : > { %p18_p9 = scmp.ge.s32.totalorder %s21_s20, 4   ;;  %s958_s16 = smov %s701_s17 }
 0x108   : > { %s959_s17 = smov %s792_s27  ;;  %s960_s18 = smov %s709_s19 }
 0x109   : > { %s961_s19 = smov %s963_s22  ;;  %20 = sbr.rel (!%p18_p9) target bundleno = 6 (0x6), region = 109 }
 0x110   :  { %396 = vsyncpa [#allocation3], 1 }
 0x111   :  { %398 = vsyncpa [#allocation3 + $0x1], 1 }
 0x112   :  { %399 = vsyncpa [#allocation5], 1 }
 0x113   :  { %401 = vsyncpa [#allocation5 + $0x1], 1 }

</bundles_post_ra>
